<compile_context>
chip_gen: v7x
topology: tpu7x:2x2x1
jax: 0.10.0
libtpu: 0.0.40
codegen_flags: <defaults>
</compile_context>

<pallas_src>
import numpy as np
import jax
import jax.numpy as jnp
from jax.experimental import pallas as pl
from jax.experimental.pallas import tpu as pltpu

_EPS = 1e-6


def _sigmoid(x):
    return 1.0 / (1.0 + jnp.exp(-x))


# ------------------------------ Pallas kernel -------------------------------
def make_kernel(V, F, E):
    """Kernel closure over the static mesh sizes (V vertices, F faces, E edges)."""
    e_off = V + 3 * F

    def kernel(bs_ref, d_ref, c_ref, m_ref, verts_ref, loss_ref):
        # bs_ref : (6, V)  rows 0-2 = logit(|v|), rows 3-5 = sign(v)   (constants)
        # d_ref  : (3, V)  displace parameter (transposed)
        # c_ref  : (3, 1)  center parameter (transposed)
        # m_ref  : (V, R)  concatenated [L; face one-hots; edge one-hots]^T
        base = bs_ref[0:3, :]                    # (3, V)
        sgn = bs_ref[3:6, :]                     # (3, V)
        centroid = jnp.tanh(c_ref[...])          # (3, 1)

        # --- vertex deformation (elementwise, lane-dense) -------------------
        vert = _sigmoid(base + d_ref[...]) * sgn
        vert = (jnp.maximum(vert, 0.0) * (1.0 - centroid)
                - jnp.maximum(-vert, 0.0) * (centroid + 1.0))
        vert = vert + centroid                   # (3, V)
        verts_ref[...] = vert

        # --- single MXU matmul: Laplacian rows + all index gathers ----------
        rows = jnp.dot(vert, m_ref[...], preferred_element_type=jnp.float32)  # (3, R)

        # Laplacian loss: sum((L @ vert)^2)  (batch == 1 so .mean() is identity)
        lv = rows[:, 0:V]
        lap = jnp.sum(lv * lv, keepdims=True)                     # (1, 1)

        # --- volume loss (signed mesh volume sum_f det(v0,v1,v2)/6) ---------
        # TODO(synk): exact sr.VolumeLoss definition unavailable; using signed volume.
        fv0 = rows[:, V:V + F]                                    # (3, F)
        fv1 = rows[:, V + F:V + 2 * F]
        fv2 = rows[:, V + 2 * F:V + 3 * F]
        cx = fv1[1:2] * fv2[2:3] - fv1[2:3] * fv2[1:2]            # (1, F)
        cy = fv1[2:3] * fv2[0:1] - fv1[0:1] * fv2[2:3]
        cz = fv1[0:1] * fv2[1:2] - fv1[1:2] * fv2[0:1]
        det = fv0[0:1] * cx + fv0[1:2] * cy + fv0[2:3] * cz       # (1, F)
        vol = jnp.sum(det, keepdims=True) / 6.0                   # (1, 1)

        # --- flatten loss over shared edges (SoftRas FlattenLoss), mean over E
        v0s = rows[:, e_off:e_off + E]                            # (3, E)
        v1s = rows[:, e_off + E:e_off + 2 * E]
        v2s = rows[:, e_off + 2 * E:e_off + 3 * E]
        v3s = rows[:, e_off + 3 * E:e_off + 4 * E]

        a1 = v1s - v0s
        b1 = v2s - v0s
        a1l2 = jnp.sum(a1 * a1, axis=0, keepdims=True)            # (1, E)
        b1l2 = jnp.sum(b1 * b1, axis=0, keepdims=True)
        a1l1 = jnp.sqrt(a1l2 + _EPS)
        b1l1 = jnp.sqrt(b1l2 + _EPS)
        ab1 = jnp.sum(a1 * b1, axis=0, keepdims=True)
        cos1 = ab1 / (a1l1 * b1l1 + _EPS)
        sin1 = jnp.sqrt(1.0 - cos1 * cos1 + _EPS)
        cb1 = b1 - a1 * (ab1 / (a1l2 + _EPS))
        cb1l1 = b1l1 * sin1

        b2 = v3s - v0s                           # a2 == a1 in the reference
        b2l2 = jnp.sum(b2 * b2, axis=0, keepdims=True)
        b2l1 = jnp.sqrt(b2l2 + _EPS)
        ab2 = jnp.sum(a1 * b2, axis=0, keepdims=True)
        cos2 = ab2 / (a1l1 * b2l1 + _EPS)
        sin2 = jnp.sqrt(1.0 - cos2 * cos2 + _EPS)
        cb2 = b2 - a1 * (ab2 / (a1l2 + _EPS))
        cb2l1 = b2l1 * sin2

        cosd = jnp.sum(cb1 * cb2, axis=0, keepdims=True) / (cb1l1 * cb2l1 + _EPS)
        flat = jnp.sum((cosd + 1.0) ** 2, keepdims=True) / float(E)   # (1, 1)

        # --- merged scalar losses -> one (1, 3) lane-contiguous output ------
        lane = jax.lax.broadcasted_iota(jnp.int32, (1, 3), 1)
        lap_b = jnp.broadcast_to(lap, (1, 3))
        flat_b = jnp.broadcast_to(flat, (1, 3))
        vol_b = jnp.broadcast_to(vol, (1, 3))
        loss_ref[...] = jnp.where(lane == 0, lap_b,
                                  jnp.where(lane == 1, flat_b, vol_b))

    return kernel


# ------------------------------ wrapper --------------------------------------
def model_forward(batch_size, buffers, displace, center):
    """Returns ((mesh_vertices, mesh_faces), laplacian_loss, flatten_loss, volume_loss)."""
    V, F, E = buffers["V"], buffers["F"], buffers["E"]
    kernel = make_kernel(V, F, E)
    vmem = pl.BlockSpec(memory_space=pltpu.MemorySpace.VMEM)

    verts_T, losses = pl.pallas_call(
        kernel,
        out_shape=(
            jax.ShapeDtypeStruct((3, V), jnp.float32),
            jax.ShapeDtypeStruct((1, 3), jnp.float32),
        ),
        in_specs=[vmem, vmem, vmem, vmem],
        out_specs=(vmem, vmem),
    )(buffers["base_sign"], displace.T, center.T, buffers["big_T"])

    vert = verts_T.T                                              # (V, 3)
    mesh_vertices = jnp.broadcast_to(vert[None], (batch_size, V, 3))
    faces = buffers["faces"]
    mesh_faces = jnp.broadcast_to(faces[None], (batch_size, faces.shape[0], 3))
    return (mesh_vertices, mesh_faces), losses[0, 0], losses[0, 1], losses[0, 2]


# ----------------------- synthetic template mesh (cube) ---------------------
def make_cube(scale=0.5):
    verts = np.array([[-1, -1, -1], [1, -1, -1], [1, 1, -1], [-1, 1, -1],
                      [-1, -1, 1], [1, -1, 1], [1, 1, 1], [-1, 1, 1]],
                     dtype=np.float32) * scale
    faces = np.array([[0, 2, 1], [0, 3, 2],      # bottom
                      [4, 5, 6], [4, 6, 7],      # top
                      [0, 1, 5], [0, 5, 4],      # front
                      [2, 3, 7], [2, 7, 6],      # back
                      [0, 4, 7], [0, 7, 3],      # left
                      [1, 2, 6], [1, 6, 5]],     # right
                     dtype=np.int32)
    return verts, faces


def build_laplacian(faces, nv):
    L = np.zeros((nv, nv), np.float32)
    for f in faces:
        for a, b in [(f[0], f[1]), (f[1], f[2]), (f[2], f[0])]:
            L[a, b] = -1.0
            L[b, a] = -1.0
    r, c = np.diag_indices(nv)
    L[r, c] = -L.sum(1)
    for i in range(nv):
        L[i, :] /= L[i, i]
    return L


def build_flatten_pairs(faces):
    edge_map = {}
    for f in faces:
        f = [int(x) for x in f]
        for a, b in [(f[0], f[1]), (f[1], f[2]), (f[2], f[0])]:
            key = (min(a, b), max(a, b))
            other = [x for x in f if x != a and x != b][0]
            edge_map.setdefault(key, []).append(other)
    v0s, v1s, v2s, v3s = [], [], [], []
    for (a, b), others in sorted(edge_map.items()):
        if len(others) == 2:
            v0s.append(a); v1s.append(b); v2s.append(others[0]); v3s.append(others[1])
    return (np.array(v0s, np.int32), np.array(v1s, np.int32),
            np.array(v2s, np.int32), np.array(v3s, np.int32))


def build_buffers(verts_np, faces_np):
    """Host-side precompute of all constant kernel inputs."""
    nv = verts_np.shape[0]
    lap_np = build_laplacian(faces_np, nv)
    e0, e1, e2, e3 = build_flatten_pairs(faces_np)

    eye = np.eye(nv, dtype=np.float32)
    blocks = ([lap_np]
              + [eye[faces_np[:, k]] for k in range(3)]
              + [eye[idx] for idx in (e0, e1, e2, e3)])
    big = np.concatenate(blocks, axis=0).astype(np.float32)      # (R, V)

    absv = np.clip(np.abs(verts_np), 1e-6, 1.0 - 1e-6)           # clamp: avoid inf/NaN
    base = np.log(absv / (1.0 - absv)).astype(np.float32)        # logit(|v|)
    sgn = np.sign(verts_np).astype(np.float32)
    base_sign = np.concatenate([base.T, sgn.T], axis=0)          # (6, V)

    return dict(
        V=nv, F=int(faces_np.shape[0]), E=int(e0.shape[0]),
        base_sign=jnp.asarray(base_sign),
        big_T=jnp.asarray(big.T),                                # (V, R)
        faces=jnp.asarray(faces_np, dtype=jnp.int32),
        lap=jnp.asarray(lap_np),
        edge_ids=(e0, e1, e2, e3),
    )


# ------------------------------- pure-JAX reference --------------------------
def reference_forward(batch_size, v, d, c, L, faces_np, edge_ids):
    absv = jnp.abs(v)
    base = jnp.log(absv / (1.0 - absv))
    centroid = jnp.tanh(c)
    vert = jax.nn.sigmoid(base + d) * jnp.sign(v)
    vert = (jnp.maximum(vert, 0.0) * (1.0 - centroid)
            - jnp.maximum(-vert, 0.0) * (centroid + 1.0))
    vert = vert + centroid

    lap = jnp.sum((L @ vert) ** 2)

    fv0, fv1, fv2 = (vert[faces_np[:, k]] for k in range(3))
    vol = jnp.sum(jnp.sum(fv0 * jnp.cross(fv1, fv2), axis=-1)) / 6.0

    v0s, v1s, v2s, v3s = (vert[i] for i in edge_ids)
    a1 = v1s - v0s
    b1 = v2s - v0s
    a1l2 = jnp.sum(a1 * a1, -1)
    b1l2 = jnp.sum(b1 * b1, -1)
    a1l1 = jnp.sqrt(a1l2 + _EPS)
    b1l1 = jnp.sqrt(b1l2 + _EPS)
    ab1 = jnp.sum(a1 * b1, -1)
    cos1 = ab1 / (a1l1 * b1l1 + _EPS)
    sin1 = jnp.sqrt(1.0 - cos1 ** 2 + _EPS)
    cb1 = b1 - a1 * (ab1 / (a1l2 + _EPS))[:, None]
    cb1l1 = b1l1 * sin1
    b2 = v3s - v0s
    b2l2 = jnp.sum(b2 * b2, -1)
    b2l1 = jnp.sqrt(b2l2 + _EPS)
    ab2 = jnp.sum(a1 * b2, -1)
    cos2 = ab2 / (a1l1 * b2l1 + _EPS)
    sin2 = jnp.sqrt(1.0 - cos2 ** 2 + _EPS)
    cb2 = b2 - a1 * (ab2 / (a1l2 + _EPS))[:, None]
    cb2l1 = b2l1 * sin2
    cosd = jnp.sum(cb1 * cb2, -1) / (cb1l1 * cb2l1 + _EPS)
    flat = jnp.mean((cosd + 1.0) ** 2)

    return jnp.tile(vert[None], (batch_size, 1, 1)), lap, flat, vol


if __name__ == "__main__":
    verts_np, faces_np = make_cube(scale=0.5)
    nv = verts_np.shape[0]
    buffers = build_buffers(verts_np, faces_np)

    # deterministic parameter init (module has zeros; use small PRNGKey(0)
    # perturbations so the test is non-degenerate).
    key = jax.random.PRNGKey(0)
    k1, k2 = jax.random.split(key)
    displace = 0.05 * jax.random.normal(k1, (nv, 3), jnp.float32)
    center = 0.1 * jax.random.normal(k2, (1, 3), jnp.float32)

    vertices = jnp.asarray(verts_np)

    batch_size = 2
    (mesh_v, mesh_f), lap, flat, vol = model_forward(batch_size, buffers, displace, center)
    jax.block_until_ready((mesh_v, mesh_f, lap, flat, vol))

    ref_v, ref_lap, ref_flat, ref_vol = reference_forward(
        batch_size, vertices, displace, center, buffers["lap"],
        faces_np, buffers["edge_ids"])

    assert mesh_v.shape == (batch_size, nv, 3) and mesh_f.shape == (batch_size, 12, 3)
    assert np.allclose(np.asarray(mesh_v), np.asarray(ref_v), atol=1e-5), "vertices mismatch"
    assert np.allclose(float(lap), float(ref_lap), atol=1e-4), "laplacian loss mismatch"
    assert np.allclose(float(flat), float(ref_flat), atol=1e-4), "flatten loss mismatch"
    assert np.allclose(float(vol), float(ref_vol), atol=1e-4), "volume loss mismatch"
    print("KERNEL_OK")
</pallas_src>

<mosaic_0001>
module attributes {stable_mosaic.version = 11 : i64} {
  func.func @kernel(%arg0: memref<6x8xf32, #tpu.memory_space<vmem>>, %arg1: memref<3x8xf32, #tpu.memory_space<vmem>>, %arg2: memref<3x1xf32, #tpu.memory_space<vmem>>, %arg3: memref<8x116xf32, #tpu.memory_space<vmem>>, %arg4: memref<3x8xf32, #tpu.memory_space<vmem>>, %arg5: memref<1x3xf32, #tpu.memory_space<vmem>>) attributes {dimension_semantics = [], scalar_prefetch = 0 : i64, scratch_operands = 0 : i64, tpu.core_type = #tpu.core_type<tc>} {
    %c0 = arith.constant 0 : index
    %c0_0 = arith.constant 0 : index
    %0 = vector.load %arg0[%c0, %c0_0] : memref<6x8xf32, #tpu.memory_space<vmem>>, vector<3x8xf32>
    %c3 = arith.constant 3 : index
    %c0_1 = arith.constant 0 : index
    %1 = vector.load %arg0[%c3, %c0_1] : memref<6x8xf32, #tpu.memory_space<vmem>>, vector<3x8xf32>
    %c0_2 = arith.constant 0 : index
    %c0_3 = arith.constant 0 : index
    %2 = vector.load %arg2[%c0_2, %c0_3] : memref<3x1xf32, #tpu.memory_space<vmem>>, vector<3x1xf32>
    %3 = math.tanh %2 : vector<3x1xf32>
    %c0_4 = arith.constant 0 : index
    %c0_5 = arith.constant 0 : index
    %4 = vector.load %arg1[%c0_4, %c0_5] : memref<3x8xf32, #tpu.memory_space<vmem>>, vector<3x8xf32>
    %5 = arith.addf %0, %4 : vector<3x8xf32>
    %cst = arith.constant 0.000000e+00 : f32
    %6 = vector.broadcast %cst : f32 to vector<3x8xf32>
    %7 = arith.subf %6, %5 : vector<3x8xf32>
    %8 = math.exp %7 : vector<3x8xf32>
    %cst_6 = arith.constant 1.000000e+00 : f32
    %9 = vector.broadcast %cst_6 : f32 to vector<3x8xf32>
    %10 = arith.addf %9, %8 : vector<3x8xf32>
    %cst_7 = arith.constant 1.000000e+00 : f32
    %11 = vector.broadcast %cst_7 : f32 to vector<3x8xf32>
    %12 = arith.divf %11, %10 : vector<3x8xf32>
    %13 = arith.mulf %12, %1 : vector<3x8xf32>
    %cst_8 = arith.constant 0.000000e+00 : f32
    %14 = vector.broadcast %cst_8 : f32 to vector<3x8xf32>
    %15 = arith.maximumf %13, %14 : vector<3x8xf32>
    %cst_9 = arith.constant 1.000000e+00 : f32
    %16 = vector.broadcast %cst_9 : f32 to vector<3x1xf32>
    %17 = arith.subf %16, %3 : vector<3x1xf32>
    %18 = vector.broadcast %17 : vector<3x1xf32> to vector<3x8xf32>
    %19 = arith.mulf %15, %18 : vector<3x8xf32>
    %cst_10 = arith.constant 0.000000e+00 : f32
    %20 = vector.broadcast %cst_10 : f32 to vector<3x8xf32>
    %21 = arith.subf %20, %13 : vector<3x8xf32>
    %cst_11 = arith.constant 0.000000e+00 : f32
    %22 = vector.broadcast %cst_11 : f32 to vector<3x8xf32>
    %23 = arith.maximumf %21, %22 : vector<3x8xf32>
    %cst_12 = arith.constant 1.000000e+00 : f32
    %24 = vector.broadcast %cst_12 : f32 to vector<3x1xf32>
    %25 = arith.addf %3, %24 : vector<3x1xf32>
    %26 = vector.broadcast %25 : vector<3x1xf32> to vector<3x8xf32>
    %27 = arith.mulf %23, %26 : vector<3x8xf32>
    %28 = arith.subf %19, %27 : vector<3x8xf32>
    %29 = vector.broadcast %3 : vector<3x1xf32> to vector<3x8xf32>
    %30 = arith.addf %28, %29 : vector<3x8xf32>
    %c0_13 = arith.constant 0 : index
    %c0_14 = arith.constant 0 : index
    %31 = vector.load %arg4[%c0_13, %c0_14] : memref<3x8xf32, #tpu.memory_space<vmem>>, vector<3x8xf32>
    tpu.vector_store %arg4[%c0_13, %c0_14], %30 {strides = array<i32>} : memref<3x8xf32, #tpu.memory_space<vmem>>, vector<3x8xf32>,
    %c0_15 = arith.constant 0 : index
    %c0_16 = arith.constant 0 : index
    %32 = vector.load %arg3[%c0_15, %c0_16] : memref<8x116xf32, #tpu.memory_space<vmem>>, vector<8x116xf32>
    %cst_17 = arith.constant dense<0.000000e+00> : vector<3x116xf32>
    %33 = tpu.matmul %30, %32, %cst_17 {dimension_numbers = #tpu.dot_dimension_numbers<[1], [0], [0], [1], [0, 0, 1, 1], [], []>} : vector<3x8xf32>, vector<8x116xf32>, vector<3x116xf32> -> vector<3x116xf32>
    %34 = vector.extract_strided_slice %33 {offsets = [0, 0], sizes = [3, 8], strides = [1, 1]} : vector<3x116xf32> to vector<3x8xf32>
    %35 = arith.mulf %34, %34 : vector<3x8xf32>
    %36 = vector.shape_cast %35 : vector<3x8xf32> to vector<1x3x8xf32>
    %cst_18 = arith.constant dense<0.000000e+00> : vector<1xf32>
    %37 = vector.multi_reduction <add>, %36, %cst_18 [1, 2] : vector<1x3x8xf32> to vector<1xf32>
    %38 = vector.shape_cast %37 : vector<1xf32> to vector<1x1x1xf32>
    %39 = vector.extract %38[0, 0, 0] : f32 from vector<1x1x1xf32>
    %40 = vector.broadcast %39 : f32 to vector<1x1xf32>
    %41 = vector.extract_strided_slice %33 {offsets = [0, 8], sizes = [3, 12], strides = [1, 1]} : vector<3x116xf32> to vector<3x12xf32>
    %42 = vector.extract_strided_slice %33 {offsets = [0, 20], sizes = [3, 12], strides = [1, 1]} : vector<3x116xf32> to vector<3x12xf32>
    %43 = vector.extract_strided_slice %33 {offsets = [0, 32], sizes = [3, 12], strides = [1, 1]} : vector<3x116xf32> to vector<3x12xf32>
    %44 = vector.extract_strided_slice %42 {offsets = [1, 0], sizes = [1, 12], strides = [1, 1]} : vector<3x12xf32> to vector<1x12xf32>
    %45 = vector.extract_strided_slice %43 {offsets = [2, 0], sizes = [1, 12], strides = [1, 1]} : vector<3x12xf32> to vector<1x12xf32>
    %46 = arith.mulf %44, %45 : vector<1x12xf32>
    %47 = vector.extract_strided_slice %42 {offsets = [2, 0], sizes = [1, 12], strides = [1, 1]} : vector<3x12xf32> to vector<1x12xf32>
    %48 = vector.extract_strided_slice %43 {offsets = [1, 0], sizes = [1, 12], strides = [1, 1]} : vector<3x12xf32> to vector<1x12xf32>
    %49 = arith.mulf %47, %48 : vector<1x12xf32>
    %50 = arith.subf %46, %49 : vector<1x12xf32>
    %51 = vector.extract_strided_slice %42 {offsets = [2, 0], sizes = [1, 12], strides = [1, 1]} : vector<3x12xf32> to vector<1x12xf32>
    %52 = vector.extract_strided_slice %43 {offsets = [0, 0], sizes = [1, 12], strides = [1, 1]} : vector<3x12xf32> to vector<1x12xf32>
    %53 = arith.mulf %51, %52 : vector<1x12xf32>
    %54 = vector.extract_strided_slice %42 {offsets = [0, 0], sizes = [1, 12], strides = [1, 1]} : vector<3x12xf32> to vector<1x12xf32>
    %55 = vector.extract_strided_slice %43 {offsets = [2, 0], sizes = [1, 12], strides = [1, 1]} : vector<3x12xf32> to vector<1x12xf32>
    %56 = arith.mulf %54, %55 : vector<1x12xf32>
    %57 = arith.subf %53, %56 : vector<1x12xf32>
    %58 = vector.extract_strided_slice %42 {offsets = [0, 0], sizes = [1, 12], strides = [1, 1]} : vector<3x12xf32> to vector<1x12xf32>
    %59 = vector.extract_strided_slice %43 {offsets = [1, 0], sizes = [1, 12], strides = [1, 1]} : vector<3x12xf32> to vector<1x12xf32>
    %60 = arith.mulf %58, %59 : vector<1x12xf32>
    %61 = vector.extract_strided_slice %42 {offsets = [1, 0], sizes = [1, 12], strides = [1, 1]} : vector<3x12xf32> to vector<1x12xf32>
    %62 = vector.extract_strided_slice %43 {offsets = [0, 0], sizes = [1, 12], strides = [1, 1]} : vector<3x12xf32> to vector<1x12xf32>
    %63 = arith.mulf %61, %62 : vector<1x12xf32>
    %64 = arith.subf %60, %63 : vector<1x12xf32>
    %65 = vector.extract_strided_slice %41 {offsets = [0, 0], sizes = [1, 12], strides = [1, 1]} : vector<3x12xf32> to vector<1x12xf32>
    %66 = arith.mulf %65, %50 : vector<1x12xf32>
    %67 = vector.extract_strided_slice %41 {offsets = [1, 0], sizes = [1, 12], strides = [1, 1]} : vector<3x12xf32> to vector<1x12xf32>
    %68 = arith.mulf %67, %57 : vector<1x12xf32>
    %69 = arith.addf %66, %68 : vector<1x12xf32>
    %70 = vector.extract_strided_slice %41 {offsets = [2, 0], sizes = [1, 12], strides = [1, 1]} : vector<3x12xf32> to vector<1x12xf32>
    %71 = arith.mulf %70, %64 : vector<1x12xf32>
    %72 = arith.addf %69, %71 : vector<1x12xf32>
    %73 = vector.shape_cast %72 : vector<1x12xf32> to vector<1x1x12xf32>
    %cst_19 = arith.constant dense<0.000000e+00> : vector<1xf32>
    %74 = vector.multi_reduction <add>, %73, %cst_19 [1, 2] : vector<1x1x12xf32> to vector<1xf32>
    %75 = vector.shape_cast %74 : vector<1xf32> to vector<1x1x1xf32>
    %76 = vector.extract %75[0, 0, 0] : f32 from vector<1x1x1xf32>
    %77 = vector.broadcast %76 : f32 to vector<1x1xf32>
    %cst_20 = arith.constant 6.000000e+00 : f32
    %78 = vector.broadcast %cst_20 : f32 to vector<1x1xf32>
    %79 = arith.divf %77, %78 : vector<1x1xf32>
    %80 = vector.extract_strided_slice %33 {offsets = [0, 44], sizes = [3, 18], strides = [1, 1]} : vector<3x116xf32> to vector<3x18xf32>
    %81 = vector.extract_strided_slice %33 {offsets = [0, 62], sizes = [3, 18], strides = [1, 1]} : vector<3x116xf32> to vector<3x18xf32>
    %82 = vector.extract_strided_slice %33 {offsets = [0, 80], sizes = [3, 18], strides = [1, 1]} : vector<3x116xf32> to vector<3x18xf32>
    %83 = vector.extract_strided_slice %33 {offsets = [0, 98], sizes = [3, 18], strides = [1, 1]} : vector<3x116xf32> to vector<3x18xf32>
    %84 = arith.subf %81, %80 : vector<3x18xf32>
    %85 = arith.subf %82, %80 : vector<3x18xf32>
    %86 = arith.mulf %84, %84 : vector<3x18xf32>
    %cst_21 = arith.constant dense<0.000000e+00> : vector<18xf32>
    %87 = vector.multi_reduction <add>, %86, %cst_21 [0] : vector<3x18xf32> to vector<18xf32>
    %88 = vector.shape_cast %87 : vector<18xf32> to vector<1x18xf32>
    %89 = arith.mulf %85, %85 : vector<3x18xf32>
    %cst_22 = arith.constant dense<0.000000e+00> : vector<18xf32>
    %90 = vector.multi_reduction <add>, %89, %cst_22 [0] : vector<3x18xf32> to vector<18xf32>
    %91 = vector.shape_cast %90 : vector<18xf32> to vector<1x18xf32>
    %cst_23 = arith.constant 9.99999997E-7 : f32
    %92 = vector.broadcast %cst_23 : f32 to vector<1x18xf32>
    %93 = arith.addf %88, %92 : vector<1x18xf32>
    %94 = math.sqrt %93 : vector<1x18xf32>
    %cst_24 = arith.constant 9.99999997E-7 : f32
    %95 = vector.broadcast %cst_24 : f32 to vector<1x18xf32>
    %96 = arith.addf %91, %95 : vector<1x18xf32>
    %97 = math.sqrt %96 : vector<1x18xf32>
    %98 = arith.mulf %84, %85 : vector<3x18xf32>
    %cst_25 = arith.constant dense<0.000000e+00> : vector<18xf32>
    %99 = vector.multi_reduction <add>, %98, %cst_25 [0] : vector<3x18xf32> to vector<18xf32>
    %100 = vector.shape_cast %99 : vector<18xf32> to vector<1x18xf32>
    %101 = arith.mulf %94, %97 : vector<1x18xf32>
    %cst_26 = arith.constant 9.99999997E-7 : f32
    %102 = vector.broadcast %cst_26 : f32 to vector<1x18xf32>
    %103 = arith.addf %101, %102 : vector<1x18xf32>
    %104 = arith.divf %100, %103 : vector<1x18xf32>
    %105 = arith.mulf %104, %104 : vector<1x18xf32>
    %cst_27 = arith.constant 1.000000e+00 : f32
    %106 = vector.broadcast %cst_27 : f32 to vector<1x18xf32>
    %107 = arith.subf %106, %105 : vector<1x18xf32>
    %cst_28 = arith.constant 9.99999997E-7 : f32
    %108 = vector.broadcast %cst_28 : f32 to vector<1x18xf32>
    %109 = arith.addf %107, %108 : vector<1x18xf32>
    %110 = math.sqrt %109 : vector<1x18xf32>
    %cst_29 = arith.constant 9.99999997E-7 : f32
    %111 = vector.broadcast %cst_29 : f32 to vector<1x18xf32>
    %112 = arith.addf %88, %111 : vector<1x18xf32>
    %113 = arith.divf %100, %112 : vector<1x18xf32>
    %114 = vector.broadcast %113 : vector<1x18xf32> to vector<3x18xf32>
    %115 = arith.mulf %84, %114 : vector<3x18xf32>
    %116 = arith.subf %85, %115 : vector<3x18xf32>
    %117 = arith.mulf %97, %110 : vector<1x18xf32>
    %118 = arith.subf %83, %80 : vector<3x18xf32>
    %119 = arith.mulf %118, %118 : vector<3x18xf32>
    %cst_30 = arith.constant dense<0.000000e+00> : vector<18xf32>
    %120 = vector.multi_reduction <add>, %119, %cst_30 [0] : vector<3x18xf32> to vector<18xf32>
    %121 = vector.shape_cast %120 : vector<18xf32> to vector<1x18xf32>
    %cst_31 = arith.constant 9.99999997E-7 : f32
    %122 = vector.broadcast %cst_31 : f32 to vector<1x18xf32>
    %123 = arith.addf %121, %122 : vector<1x18xf32>
    %124 = math.sqrt %123 : vector<1x18xf32>
    %125 = arith.mulf %84, %118 : vector<3x18xf32>
    %cst_32 = arith.constant dense<0.000000e+00> : vector<18xf32>
    %126 = vector.multi_reduction <add>, %125, %cst_32 [0] : vector<3x18xf32> to vector<18xf32>
    %127 = vector.shape_cast %126 : vector<18xf32> to vector<1x18xf32>
    %128 = arith.mulf %94, %124 : vector<1x18xf32>
    %cst_33 = arith.constant 9.99999997E-7 : f32
    %129 = vector.broadcast %cst_33 : f32 to vector<1x18xf32>
    %130 = arith.addf %128, %129 : vector<1x18xf32>
    %131 = arith.divf %127, %130 : vector<1x18xf32>
    %132 = arith.mulf %131, %131 : vector<1x18xf32>
    %cst_34 = arith.constant 1.000000e+00 : f32
    %133 = vector.broadcast %cst_34 : f32 to vector<1x18xf32>
    %134 = arith.subf %133, %132 : vector<1x18xf32>
    %cst_35 = arith.constant 9.99999997E-7 : f32
    %135 = vector.broadcast %cst_35 : f32 to vector<1x18xf32>
    %136 = arith.addf %134, %135 : vector<1x18xf32>
    %137 = math.sqrt %136 : vector<1x18xf32>
    %cst_36 = arith.constant 9.99999997E-7 : f32
    %138 = vector.broadcast %cst_36 : f32 to vector<1x18xf32>
    %139 = arith.addf %88, %138 : vector<1x18xf32>
    %140 = arith.divf %127, %139 : vector<1x18xf32>
    %141 = vector.broadcast %140 : vector<1x18xf32> to vector<3x18xf32>
    %142 = arith.mulf %84, %141 : vector<3x18xf32>
    %143 = arith.subf %118, %142 : vector<3x18xf32>
    %144 = arith.mulf %124, %137 : vector<1x18xf32>
    %145 = arith.mulf %116, %143 : vector<3x18xf32>
    %cst_37 = arith.constant dense<0.000000e+00> : vector<18xf32>
    %146 = vector.multi_reduction <add>, %145, %cst_37 [0] : vector<3x18xf32> to vector<18xf32>
    %147 = vector.shape_cast %146 : vector<18xf32> to vector<1x18xf32>
    %148 = arith.mulf %117, %144 : vector<1x18xf32>
    %cst_38 = arith.constant 9.99999997E-7 : f32
    %149 = vector.broadcast %cst_38 : f32 to vector<1x18xf32>
    %150 = arith.addf %148, %149 : vector<1x18xf32>
    %151 = arith.divf %147, %150 : vector<1x18xf32>
    %cst_39 = arith.constant 1.000000e+00 : f32
    %152 = vector.broadcast %cst_39 : f32 to vector<1x18xf32>
    %153 = arith.addf %151, %152 : vector<1x18xf32>
    %154 = arith.mulf %153, %153 : vector<1x18xf32>
    %155 = vector.shape_cast %154 : vector<1x18xf32> to vector<1x1x18xf32>
    %cst_40 = arith.constant dense<0.000000e+00> : vector<1xf32>
    %156 = vector.multi_reduction <add>, %155, %cst_40 [1, 2] : vector<1x1x18xf32> to vector<1xf32>
    %157 = vector.shape_cast %156 : vector<1xf32> to vector<1x1x1xf32>
    %158 = vector.extract %157[0, 0, 0] : f32 from vector<1x1x1xf32>
    %159 = vector.broadcast %158 : f32 to vector<1x1xf32>
    %cst_41 = arith.constant 1.800000e+01 : f32
    %160 = vector.broadcast %cst_41 : f32 to vector<1x1xf32>
    %161 = arith.divf %159, %160 : vector<1x1xf32>
    %162 = tpu.iota {dimensions = array<i32: 1>} : vector<1x3xi32>
    %163 = vector.shape_cast %40 : vector<1x1xf32> to vector<1x1xf32>
    %164 = vector.broadcast %163 : vector<1x1xf32> to vector<1x3xf32>
    %165 = vector.shape_cast %161 : vector<1x1xf32> to vector<1x1xf32>
    %166 = vector.broadcast %165 : vector<1x1xf32> to vector<1x3xf32>
    %167 = vector.shape_cast %79 : vector<1x1xf32> to vector<1x1xf32>
    %168 = vector.broadcast %167 : vector<1x1xf32> to vector<1x3xf32>
    %c0_i32 = arith.constant 0 : i32
    %169 = vector.broadcast %c0_i32 : i32 to vector<1x3xi32>
    %170 = arith.cmpi eq, %162, %169 : vector<1x3xi32>
    %c1_i32 = arith.constant 1 : i32
    %171 = vector.broadcast %c1_i32 : i32 to vector<1x3xi32>
    %172 = arith.cmpi eq, %162, %171 : vector<1x3xi32>
    %173 = arith.select %172, %166, %168 : vector<1x3xi1>, vector<1x3xf32>
    %174 = arith.select %170, %164, %173 : vector<1x3xi1>, vector<1x3xf32>
    %c0_42 = arith.constant 0 : index
    %c0_43 = arith.constant 0 : index
    %175 = vector.load %arg5[%c0_42, %c0_43] : memref<1x3xf32, #tpu.memory_space<vmem>>, vector<1x3xf32>
    tpu.vector_store %arg5[%c0_42, %c0_43], %174 {strides = array<i32>} : memref<1x3xf32, #tpu.memory_space<vmem>>, vector<1x3xf32>,
    return
  }
}

</mosaic_0001>

<bundles_post_ra>
// kernel: tpu_custom_call.1
= control target key start
LH: loop header
LB: loop body
LE: loop exit
PB: predicated region body
PF: predicated region fallthrough
CT: control target
= control target key end

     0   :  { %11 = vsyncpa [#allocation3], 0  ;;  %s738_s0 = inlined_call_operand.hbm [shape: f32[6,8], index: 0, kind: input, shape index: {}]   ;;  %s739_s1 = inlined_call_operand.vmem [shape: f32[3,8], index: 1, kind: input, shape index: {}]   ;;  %s740_s2 = inlined_call_operand.vmem [shape: f32[3,1], index: 2, kind: input, shape index: {}]   ;;  %s741_s3 = inlined_call_operand.vmem [shape: f32[8,116], index: 3, kind: input, shape index: {}]   ;;  %s742_s4 = inlined_call_operand.hbm [shape: f32[3,8], index: 4, kind: output, shape index: {0}]   ;;  %s743_s5 = inlined_call_operand.hbm [shape: f32[1,3], index: 5, kind: output, shape index: {1}]  }
   0x1   :  { %12 = vsyncpa [#allocation4], 0 }
   0x2   :  { %13 = vsyncpa [#allocation7], 0  ;;  %s582_s18 = smov [#allocation2]   ;;  %s510_s22 = scalar_lea.hbm %s738_s0, 128 }
   0x3   :  { %s20_s19 = sshll.u32 %s582_s18, 4  ;;  %p511_p0 = scmp.ne.s32.totalorder %s738_s0, %s510_s22  ;;  %s21_s19 = int_to_ptr.vmem [resolvable:$true] %s20_s19 }
   0x4   :  { %p514_p1 = scmp.lt.u32.totalorder %s510_s22, %s738_s0 }
   0x6   :  { %p516_p2 = pnand %p514_p1, %p511_p0 }
   0x8   :  { %519 = shalt.err (!%p516_p2)
}
   0x9   :  { %s520_s27 = scalar_lea.vmem %s21_s19, 128  ;;  %p525_p4 = scmp.lt.s32.totalorder %s21_s19, %s21_s19 }
   0xa   :  { %p521_p3 = scmp.ne.s32.totalorder %s21_s19, %s520_s27  ;;  %p526_p5 = scmp.lt.s32.totalorder %s520_s27, %s520_s27 }
   0xc   :  { %p527_p6 = por %p526_p5, %p525_p4 }
   0xe   :  { %p528_p7 = pnand %p527_p6, %p521_p3 }
  0x10   :  { %531 = shalt.err (!%p528_p7)
}
  0x11   :  { %23 = dma.hbm_to_vmem [thread:$0]  %s738_s0, 128, %s21_s19, [#allocation3]  }
  0x12   :  { %576 = dma.done.wait [#allocation3], 128  }
  0x13   :  { %577 = vsyncadd [#allocation3], 4294967168  ;;  %v583_v0 = vmov 0   ;;  %v35_v1 = vld [vmem:[%s740_s2] sm:$0x7]  ;;  %v584_v5 = vmov 0.0  }
  0x14   :  { %484 = vset.pattern.permute.xlu0 %v583_v0  ;;  %485 = vset.pattern.permute.xlu1 %v583_v0  ;;  %486 = vtanh.f32 %v35_v1  ;;  %v72_v6 = vld [vmem:[%s741_s3] sm:$0xff]  ;;  %vm585_vm0 = vmmov 0   ;;  %vm73_vm1 = vcmask 64512   ;;  %vm70_vm2 = vcmask 59392   ;;  %s587_s2 = smov 54   ;;  %s588_s3 = smov 36  }
  0x15   :  { %459 = vmatprep.subr.mxu0 %v584_v5  ;;  %461 = vmatprep.mubr.msk.f32.mxu0 %vm585_vm0, %v584_v5  ;;  %v37_v7 = vld [vmem:[%s739_s1] sm:$0x7]  ;;  %v34_v15 = vld [vmem:[#allocation2 + $0x3] sm:$0x7]  ;;  %s586_s1 = smov 18   ;;  %vm320_vm3 = vcmask 944912  }
  0x16   :  { %460 = vmatpush3.msra.mxu0 %v72_v6  ;;  %v33_v8 = vld [vmem:[#allocation2] sm:$0x7]  ;;  %s589_s10 = smov 92   ;;  %vm248_vm4 = vcmask 797312   ;;  %s590_s11 = smov 110   ;;  %vm239_vm9 = vcmask 649712  }
  0x17   :  { %v38_v9 = vadd.f32 %v37_v7, %v33_v8  ;;  %s591_s12 = smov 116   ;;  %s592_s13 = smov 120   ;;  %vm216_vm0 = vcmask 90112  }
  0x18   :  { %s593_s14 = smov 48   ;;  %s594_s15 = smov [#allocation5]  }
  0x19   :  { %v39_v10 = vsub.f32 0.0, %v38_v9  ;;  %s433_s16 = sshll.u32 %s594_s15, 4  ;;  %s434_s16 = int_to_ptr.vmem [resolvable:$true] %s433_s16 }
  0x1a   :  { %s532_s17 = scalar_lea.vmem %s434_s16, 64  ;;  %p537_p9 = scmp.lt.s32.totalorder %s434_s16, %s434_s16 }
  0x1b   :  { %v40_v11 = vmul.f32 1.442695, %v39_v10  ;;  %p533_p8 = scmp.ne.s32.totalorder %s434_s16, %s532_s17  ;;  %p538_p10 = scmp.lt.s32.totalorder %s532_s17, %s532_s17 }
  0x1d   :  { %488 = vpow2.f32 %v40_v11  ;;  %p539_p11 = por %p538_p10, %p537_p9 }
  0x1e   :  { %v487_v2 = vpop.eup %486 }
  0x1f   :  { %v47_v3 = vsub.f32 1.0, %v487_v2  ;;  %66 = vperm.xlu1 %485, %v487_v2   ;;  %v56_v4 = vadd.f32 1.0, %v487_v2  ;;  %p540_p12 = pnand %p539_p11, %p533_p8 }
  0x21   :  { %50 = vperm.xlu0 %484, %v47_v3  }
  0x25   :  { %59 = vperm.xlu0 %484, %v56_v4  }
  0x27   :  { %v489_v12 = vpop.eup %488 }
  0x28   :  { %v42_v13 = vadd.f32 1.0, %v489_v12 }
  0x2a   :  { %490 = vrcp.f32 %v42_v13 }
  0x34   :  { %v491_v14 = vpop.eup %490 }
  0x35   :  { %v45_v16 = vmul.f32 %v491_v14, %v34_v15 }
  0x37   :  { %v54_v17 = vsub.f32 0.0, %v45_v16  ;;  %v46_v19 = vmax.f32 %v45_v16, 0.0 }
  0x39   :  { %v55_v20 = vmax.f32 %v54_v17, 0.0 }
  0x9e   :  { %v67_v24 = vpop.permute.xlu1 %66 }
  0xa0   :  { %v51_v18 = vpop.permute.xlu0 %50 }
  0xa1   :  { %v53_v22 = vmul.f32 %v51_v18, %v46_v19 }
  0xa4   :  { %v60_v21 = vpop.permute.xlu0 %59 }
  0xa5   :  { %v62_v23 = vmul.f32 %v60_v21, %v55_v20 }
  0xa7   :  { %v63_v25 = vsub.f32 %v53_v22, %v62_v23 }
  0xa9   :  { %v69_v26 = vadd.f32 %v67_v24, %v63_v25 }
  0xab   :  { %462 = vmatmul.mubr.msk.f32.vlgmr.msra.gmra.mrb[0].mxu0 %vm73_vm1, %v69_v26  ;;  %71 = vst.msk [vmem:[#allocation5] sm:$0x7] %vm70_vm2, %v69_v26  ;;  %vm404_vm1 = vcmask 139264  }
 0x17e   :  { %v648_v27 = vpop.f32.mrb[0].mxu0 }
 0x17f   :  { %230 = vrot.lane.b32.xlu0 %v648_v27, %s586_s1  ;;  %315 = vrot.lane.b32.xlu1 %v648_v27, %s587_s2  ;;  %v463_v28 = vpop.f32.mrb[1].mxu0 }
 0x183   :  { %234 = vrot.lane.b32.xlu1 %v648_v27, %s588_s3 }
 0x1f1   :  { %v316_v29 = vpop.permute.xlu1 %315  ;;  %v231_v61 = vpop.permute.xlu0 %230 }
 0x1f2   :  { %v656_v30 = vsub.f32 %v648_v27, %v316_v29  ;;  %v233_v62 = vsub.f32 %v648_v27, %v231_v61 }
 0x1f4   :  { %v319_v31 = vmul.f32 %v656_v30, %v656_v30  ;;  %337 = vrot.lane.b32.xlu0 %v656_v30, %s589_s10  ;;  %v238_v63 = vmul.f32 %v233_v62, %v233_v62 }
 0x1f5   :  { %v235_v32 = vpop.permute.xlu1 %234 }
 0x1f6   :  { %v321_v33 = vsel %vm320_vm3, %v319_v31, 0.0  ;;  %v663_v34 = vsub.f32 %v648_v27, %v235_v32  ;;  %v240_v0 = vsel %vm239_vm9, %v238_v63, 0.0  ;;  %v178_v32 = vrot.slane %v648_v27, 2 }
 0x1f7   :  { %v322_v35 = vrot.slane %v321_v33, 4  ;;  %v241_v1 = vrot.slane %v240_v0, 4 }
 0x1f8   :  { %v247_v36 = vmul.f32 %v663_v34, %v663_v34  ;;  %273 = vrot.lane.b32.xlu0 %v663_v34, %s590_s11 }
 0x1f9   :  { %v323_v37 = vadd.f32 %v322_v35, %v321_v33  ;;  %v242_v2 = vadd.f32 %v241_v1, %v240_v0  ;;  %v173_v35 = vrot.slane %v648_v27, 6  ;;  %v164_v1 = vrot.slane %v648_v27, 7 }
 0x1fa   :  { %v249_v38 = vsel %vm248_vm4, %v247_v36, 0.0 }
 0x1fb   :  { %v324_v39 = vrot.slane %v323_v37, 2  ;;  %v250_v40 = vrot.slane %v249_v38, 4  ;;  %v243_v3 = vrot.slane %v242_v2, 2 }
 0x1fd   :  { %v325_v41 = vadd.f32 %v324_v39, %v323_v37  ;;  %v251_v42 = vadd.f32 %v250_v40, %v249_v38  ;;  %v244_v4 = vadd.f32 %v243_v3, %v242_v2  ;;  %v159_v3 = vrot.slane %v648_v27, 1 }
 0x1ff   :  { %v326_v43 = vrot.slane %v325_v41, 1  ;;  %v252_v44 = vrot.slane %v251_v42, 2  ;;  %v245_v5 = vrot.slane %v244_v4, 1 }
 0x201   :  { %v327_v45 = vadd.f32 %v326_v43, %v325_v41  ;;  %v253_v46 = vadd.f32 %v252_v44, %v251_v42  ;;  %v246_v6 = vadd.f32 %v245_v5, %v244_v4 }
 0x203   :  { %v328_v47 = vadd.f32 1e-06, %v327_v45  ;;  %v254_v48 = vrot.slane %v253_v46, 1  ;;  %v256_v8 = vadd.f32 1e-06, %v246_v6 }
 0x205   :  { %v255_v49 = vadd.f32 %v254_v48, %v253_v46  ;;  %492 = vrsqrt.f32 %v328_v47  ;;  %vm331_vm5 = vcmp.eq.f32.partialorder %v328_v47, inf  ;;  %v334_v53 = vand.u32 2147483648, %v328_v47 }
 0x206   :  { %vm333_vm6 = vcmp.eq.f32.partialorder %v328_v47, 0.0  ;;  %vm259_vm10 = vcmp.eq.f32.partialorder %v256_v8, inf  ;;  %v262_v38 = vand.u32 2147483648, %v256_v8  ;;  %vm261_vm11 = vcmp.eq.f32.partialorder %v256_v8, 0.0 }
 0x207   :  { %v264_v50 = vadd.f32 1e-06, %v255_v49 }
 0x209   :  { %494 = vrsqrt.f32 %v264_v50  ;;  %vm267_vm7 = vcmp.eq.f32.partialorder %v264_v50, inf  ;;  %v270_v58 = vand.u32 2147483648, %v264_v50  ;;  %vm269_vm8 = vcmp.eq.f32.partialorder %v264_v50, 0.0 }
 0x20a   :  { %496 = vrcp.f32 %v256_v8 }
 0x20b   :  { %498 = vrsqrt.f32 %v256_v8 }
 0x20f   :  { %v493_v51 = vpop.eup %492 }
 0x210   :  { %v330_v52 = vmul.f32 %v493_v51, %v328_v47 }
 0x212   :  { %v332_v54 = vsel %vm331_vm5, %v328_v47, %v330_v52 }
 0x213   :  { %v495_v55 = vpop.eup %494  ;;  %v670_v56 = vsel %vm333_vm6, %v334_v53, %v332_v54 }
 0x214   :  { %349 = vrot.lane.b32.xlu1 %v670_v56, %s589_s10  ;;  %v266_v57 = vmul.f32 %v495_v55, %v264_v50  ;;  %v497_v24 = vpop.eup %496 }
 0x215   :  { %v499_v29 = vpop.eup %498 }
 0x216   :  { %v268_v59 = vsel %vm267_vm7, %v264_v50, %v266_v57  ;;  %v258_v33 = vmul.f32 %v499_v29, %v256_v8 }
 0x217   :  { %v674_v60 = vsel %vm269_vm8, %v270_v58, %v268_v59 }
 0x218   :  { %285 = vrot.lane.b32.xlu1 %v674_v60, %s590_s11  ;;  %v260_v37 = vsel %vm259_vm10, %v256_v8, %v258_v33 }
 0x219   :  { %v263_v40 = vsel %vm261_vm11, %v262_v38, %v260_v37 }
 0x266   :  { %v338_v7 = vpop.permute.xlu0 %337 }
 0x267   :  { %v340_v9 = vmul.f32 %v338_v7, %v233_v62 }
 0x269   :  { %v341_v10 = vsel %vm239_vm9, %v340_v9, 0.0 }
 0x26a   :  { %v342_v11 = vrot.slane %v341_v10, 4  ;;  %v274_v12 = vpop.permute.xlu0 %273 }
 0x26b   :  { %v276_v13 = vmul.f32 %v274_v12, %v233_v62 }
 0x26c   :  { %v343_v14 = vadd.f32 %v342_v11, %v341_v10 }
 0x26d   :  { %v277_v15 = vsel %vm239_vm9, %v276_v13, 0.0 }
 0x26e   :  { %v344_v16 = vrot.slane %v343_v14, 2  ;;  %v278_v17 = vrot.slane %v277_v15, 4 }
 0x270   :  { %v345_v18 = vadd.f32 %v344_v16, %v343_v14  ;;  %v279_v19 = vadd.f32 %v278_v17, %v277_v15 }
 0x272   :  { %v346_v20 = vrot.slane %v345_v18, 1  ;;  %v280_v21 = vrot.slane %v279_v19, 2 }
 0x274   :  { %v347_v22 = vadd.f32 %v346_v20, %v345_v18  ;;  %v281_v23 = vadd.f32 %v280_v21, %v279_v19 }
 0x276   :  { %v366_v25 = vmul.f32 %v497_v24, %v347_v22  ;;  %v282_v26 = vrot.slane %v281_v23, 1 }
 0x278   :  { %v367_v28 = vmul.f32 %v366_v25, %v233_v62  ;;  %v283_v31 = vadd.f32 %v282_v26, %v281_v23 }
 0x27a   :  { %369 = vrot.lane.b32.xlu0 %v367_v28, %s588_s3  ;;  %v303_v36 = vmul.f32 %v497_v24, %v283_v31 }
 0x27c   :  { %v304_v39 = vmul.f32 %v303_v36, %v233_v62 }
 0x27e   :  { %179 = vrot.lane.b32.xlu0 %v178_v32, %s591_s12 }
 0x282   :  { %174 = vrot.lane.b32.xlu0 %v173_v35, %s591_s12 }
 0x286   :  { %v350_v41 = vpop.permute.xlu1 %349  ;;  %306 = vrot.lane.b32.xlu0 %v304_v39, %s586_s1 }
 0x287   :  { %v352_v42 = vmul.f32 %v350_v41, %v263_v40 }
 0x289   :  { %v353_v43 = vadd.f32 1e-06, %v352_v42 }
 0x28a   :  { %v286_v44 = vpop.permute.xlu1 %285 }
 0x28b   :  { %500 = vrcp.f32 %v353_v43  ;;  %v288_v45 = vmul.f32 %v286_v44, %v263_v40 }
 0x28d   :  { %v289_v46 = vadd.f32 1e-06, %v288_v45 }
 0x28f   :  { %502 = vrcp.f32 %v289_v46 }
 0x295   :  { %v501_v47 = vpop.eup %500 }
 0x296   :  { %v355_v48 = vmul.f32 %v501_v47, %v347_v22 }
 0x298   :  { %v356_v49 = vmul.f32 %v355_v48, %v355_v48 }
 0x299   :  { %v503_v50 = vpop.eup %502 }
 0x29a   :  { %v357_v51 = vsub.f32 1.0, %v356_v49  ;;  %v291_v52 = vmul.f32 %v503_v50, %v283_v31 }
 0x29c   :  { %v358_v53 = vadd.f32 1e-06, %v357_v51  ;;  %v292_v54 = vmul.f32 %v291_v52, %v291_v52 }
 0x29e   :  { %v293_v55 = vsub.f32 1.0, %v292_v54  ;;  %504 = vrsqrt.f32 %v358_v53  ;;  %vm361_vm12 = vcmp.eq.f32.partialorder %v358_v53, inf  ;;  %v364_v61 = vand.u32 2147483648, %v358_v53 }
 0x29f   :  { %vm363_vm13 = vcmp.eq.f32.partialorder %v358_v53, 0.0 }
 0x2a0   :  { %v294_v57 = vadd.f32 1e-06, %v293_v55  ;;  %v147_v55 = vmul.f32 %v648_v27, %v648_v27 }
 0x2a2   :  { %506 = vrsqrt.f32 %v294_v57  ;;  %vm297_vm14 = vcmp.eq.f32.partialorder %v294_v57, inf  ;;  %v300_v5 = vand.u32 2147483648, %v294_v57  ;;  %vm299_vm15 = vcmp.eq.f32.partialorder %v294_v57, 0.0 }
 0x2a8   :  { %v505_v58 = vpop.eup %504 }
 0x2a9   :  { %v360_v59 = vmul.f32 %v505_v58, %v358_v53 }
 0x2ab   :  { %v362_v62 = vsel %vm361_vm12, %v358_v53, %v360_v59 }
 0x2ac   :  { %v365_v63 = vsel %vm363_vm13, %v364_v61, %v362_v62  ;;  %v507_v0 = vpop.eup %506 }
 0x2ad   :  { %374 = vrot.lane.b32.xlu1 %v365_v63, %s588_s3  ;;  %v296_v2 = vmul.f32 %v507_v0, %v294_v57 }
 0x2af   :  { %v298_v4 = vsel %vm297_vm14, %v294_v57, %v296_v2  ;;  %v148_v57 = vsel %vm70_vm2, %v147_v55, 0.0 }
 0x2b0   :  { %v301_v6 = vsel %vm299_vm15, %v300_v5, %v298_v4 }
 0x2b1   :  { %165 = vrot.lane.b32.xlu1 %v164_v1, %s591_s12 }
 0x2b5   :  { %160 = vrot.lane.b32.xlu1 %v159_v3, %s591_s12 }
 0x2b9   :  { %311 = vrot.lane.b32.xlu1 %v301_v6, %s586_s1 }
 0x2ec   :  { %v370_v7 = vpop.permute.xlu0 %369 }
 0x2ed   :  { %v372_v8 = vsub.f32 %v656_v30, %v370_v7 }
 0x2ef   :  { %379 = vrot.lane.b32.xlu0 %v372_v8, %s590_s11 }
 0x2f0   :  { %v180_v9 = vpop.permute.xlu0 %179 }
 0x2f1   :  { %v182_v10 = vmul.f32 %v180_v9, %v648_v27 }
 0x2f3   :  { %v184_v12 = vrot.slane %v182_v10, 6 }
 0x2f4   :  { %v175_v11 = vpop.permute.xlu0 %174 }
 0x2f5   :  { %v177_v13 = vmul.f32 %v175_v11, %v648_v27 }
 0x2f7   :  { %v186_v14 = vsub.f32 %v177_v13, %v184_v12 }
 0x2f8   :  { %v307_v25 = vpop.permute.xlu0 %306 }
 0x2f9   :  { %v194_v15 = vrot.slane %v186_v14, 1 }
 0x2fb   :  { %195 = vrot.lane.b32.xlu0 %v194_v15, %s591_s12 }
 0x31f   :  { %v375_v16 = vpop.permute.xlu1 %374 }
 0x320   :  { %v377_v17 = vmul.f32 %v375_v16, %v670_v56  ;;  %v309_v56 = vsub.f32 %v663_v34, %v307_v25 }
 0x322   :  { %391 = vrot.lane.b32.xlu1 %v377_v17, %s590_s11 }
 0x323   :  { %v166_v18 = vpop.permute.xlu1 %165 }
 0x324   :  { %v168_v30 = vmul.f32 %v166_v18, %v648_v27 }
 0x326   :  { %v170_v20 = vrot.slane %v168_v30, 1 }
 0x327   :  { %v161_v19 = vpop.permute.xlu1 %160 }
 0x328   :  { %v163_v21 = vmul.f32 %v161_v19, %v648_v27 }
 0x32a   :  { %v172_v22 = vsub.f32 %v163_v21, %v170_v20 }
 0x32b   :  { %v312_v32 = vpop.permute.xlu1 %311 }
 0x32c   :  { %v203_v23 = vrot.slane %v172_v22, 6  ;;  %v188_v24 = vrot.slane %v172_v22, 1  ;;  %v314_v35 = vmul.f32 %v312_v32, %v674_v60 }
 0x32e   :  { %204 = vrot.lane.b32.xlu0 %v203_v23, %s591_s12  ;;  %189 = vrot.lane.b32.xlu1 %v188_v24, %s591_s12 }
 0x361   :  { %v380_v26 = vpop.permute.xlu0 %379 }
 0x362   :  { %v382_v28 = vmul.f32 %v380_v26, %v309_v56 }
 0x364   :  { %v383_v29 = vsel %vm248_vm4, %v382_v28, 0.0 }
 0x365   :  { %v384_v31 = vrot.slane %v383_v29, 4 }
 0x367   :  { %v385_v33 = vadd.f32 %v384_v31, %v383_v29 }
 0x369   :  { %v386_v38 = vrot.slane %v385_v33, 2 }
 0x36b   :  { %v387_v40 = vadd.f32 %v386_v38, %v385_v33 }
 0x36d   :  { %v196_v41 = vpop.permute.xlu0 %195  ;;  %v388_v43 = vrot.slane %v387_v40, 1 }
 0x36e   :  { %v198_v42 = vmul.f32 %v196_v41, %v648_v27 }
 0x36f   :  { %v389_v48 = vadd.f32 %v388_v43, %v387_v40 }
 0x370   :  { %v200_v45 = vrot.slane %v198_v42, 1 }
 0x394   :  { %v392_v36 = vpop.permute.xlu1 %391 }
 0x395   :  { %v394_v37 = vmul.f32 %v392_v36, %v314_v35 }
 0x397   :  { %v395_v39 = vadd.f32 1e-06, %v394_v37 }
 0x399   :  { %508 = vrcp.f32 %v395_v39 }
 0x3a0   :  { %v205_v44 = vpop.permute.xlu0 %204  ;;  %v190_v34 = vpop.permute.xlu1 %189 }
 0x3a1   :  { %v207_v46 = vmul.f32 %v205_v44, %v648_v27  ;;  %v192_v47 = vmul.f32 %v190_v34, %v648_v27 }
 0x3a3   :  { %v509_v49 = vpop.eup %508  ;;  %v209_v60 = vrot.slane %v207_v46, 2  ;;  %v202_v50 = vadd.f32 %v200_v45, %v192_v47 }
 0x3a4   :  { %v397_v51 = vmul.f32 %v509_v49, %v389_v48 }
 0x3a5   :  { %v211_v52 = vadd.f32 %v209_v60, %v202_v50 }
 0x3a6   :  { %v398_v53 = vadd.f32 1.0, %v397_v51 }
 0x3a7   :  { %213 = vrot.lane.b32.xlu1 %v211_v52, %s592_s13 }
 0x3a8   :  { %v399_v54 = vmul.f32 %v398_v53, %v398_v53 }
 0x3aa   :  { %401 = vrot.lane.b32.xlu0 %v399_v54, %s593_s14 }
 0x3cb   :  { %149 = vadd.xlane.f32.xlu1 %v148_v57 }
 0x419   :  { %v214_v58 = vpop.permute.xlu1 %213 }
 0x41a   :  { %v217_v59 = vsel %vm216_vm0, %v214_v58, 0.0 }
 0x41b   :  { %218 = vadd.xlane.f32.xlu0 %v217_v59 }
 0x41c   :  { %v402_v61 = vpop.permute.xlu0 %401 }
 0x41d   :  { %v405_v62 = vsel %vm404_vm1, %v402_v61, 0.0 }
 0x41f   :  { %406 = vadd.xlane.f32.xlu0 %v405_v62 }
 0x458   :  { %v150_v63 = vpop.xlane.xlu1 %149 }
 0x459   :  { %v151_v0 = vrot.slane %v150_v63, 4 }
 0x45b   :  { %v152_v1 = vadd.f32 %v151_v0, %v150_v63 }
 0x45d   :  { %v153_v2 = vrot.slane %v152_v1, 2 }
 0x45f   :  { %v154_v3 = vadd.f32 %v153_v2, %v152_v1 }
 0x461   :  { %v155_v4 = vrot.slane %v154_v3, 1 }
 0x463   :  { %v156_v5 = vadd.f32 %v155_v4, %v154_v3 }
 0x465   :  { %464 = vpush %v156_v5 }
 0x466   :  { %543 = shalt.err (!%p540_p12)
}
 0x467   :  { %s544_s20 = scalar_lea.hbm %s742_s4, 64 }
 0x468   :  { %p545_p13 = scmp.ne.s32.totalorder %s742_s4, %s544_s20  ;;  %p548_p0 = scmp.lt.u32.totalorder %s544_s20, %s742_s4 }
 0x46a   :  { %p550_p1 = pnand %p548_p0, %p545_p13 }
 0x46c   :  { %553 = shalt.err (!%p550_p1)
}
 0x46d   :  { %436 = dma.vmem_to_hbm [thread:$0]  %s434_s16, 64, %s742_s4, [#allocation4]   ;;  %v418_v30 = vlaneseq  ;;  %vm425_vm4 = vcmask 16384  }
 0x46e   :  { %s595_s29 = smov [#allocation6]  }
 0x46f   :  { %v419_v19 = vand.u32 127, %v418_v30  ;;  %s443_s30 = sshll.u32 %s595_s29, 4  ;;  %s444_s30 = int_to_ptr.vmem [resolvable:$true] %s443_s30 }
 0x470   :  { %s554_s6 = scalar_lea.vmem %s444_s30, 16  ;;  %s558_s7 = scalar_lea.vmem %s444_s30, 32 }
 0x471   :  { %vm422_vm2 = vcmp.eq.s32.totalorder %v419_v19, 1  ;;  %vm421_vm3 = vcmp.eq.s32.totalorder %v419_v19, 0  ;;  %p555_p2 = scmp.ne.s32.totalorder %s444_s30, %s554_s6  ;;  %p559_p3 = scmp.lt.s32.totalorder %s444_s30, %s444_s30 }
 0x472   :  { %p560_p4 = scmp.lt.s32.totalorder %s558_s7, %s554_s6 }
 0x474   :  { %p561_p5 = por %p560_p4, %p559_p3 }
 0x476   :  { %p562_p6 = pnand %p561_p5, %p555_p2 }
 0x496   :  { %s465_s27 = spop %464 }
 0x497   :  { %v420_v24 = vstv %s465_s27 }
 0x4a8   :  { %v219_v27 = vpop.xlane.xlu0 %218 }
 0x4a9   :  { %v220_v6 = vrot.slane %v219_v27, 4 }
 0x4ab   :  { %v221_v7 = vadd.f32 %v220_v6, %v219_v27 }
 0x4ac   :  { %v407_v8 = vpop.xlane.xlu0 %406 }
 0x4ad   :  { %v222_v9 = vrot.slane %v221_v7, 2  ;;  %v408_v10 = vrot.slane %v407_v8, 4 }
 0x4af   :  { %v409_v11 = vadd.f32 %v408_v10, %v407_v8  ;;  %v223_v12 = vadd.f32 %v222_v9, %v221_v7 }
 0x4b1   :  { %v410_v13 = vrot.slane %v409_v11, 2  ;;  %v224_v14 = vrot.slane %v223_v12, 1 }
 0x4b3   :  { %v411_v15 = vadd.f32 %v410_v13, %v409_v11  ;;  %v225_v16 = vadd.f32 %v224_v14, %v223_v12 }
 0x4b5   :  { %466 = vpush %v225_v16  ;;  %v412_v17 = vrot.slane %v411_v15, 1 }
 0x4b7   :  { %v413_v18 = vadd.f32 %v412_v17, %v411_v15 }
 0x4b9   :  { %468 = vpush %v413_v18 }
 0x4e6   :  { %s467_s28 = spop %466 }
 0x4e7   :  { %v227_v20 = vstv %s467_s28 }
 0x4e8   :  { %v229_v22 = vmul.f32 0.16666667, %v227_v20 }
 0x4ea   :  { %s469_s4 = spop %468 }
 0x4eb   :  { %v415_v21 = vstv %s469_s4 }
 0x4ec   :  { %v417_v23 = vmul.f32 0.055555556, %v415_v21 }
 0x4ee   :  { %v423_v25 = vsel %vm422_vm2, %v417_v23, %v229_v22 }
 0x4ef   :  { %v424_v26 = vsel %vm421_vm3, %v420_v24, %v423_v25 }
 0x4f0   :  { %426 = vst.msk [vmem:[#allocation6] sm:$0x1] %vm425_vm4, %v424_v26 }
 0x4f1   :  { %565 = shalt.err (!%p562_p6)
}
 0x4f2   :  { %s566_s9 = scalar_lea.hbm %s743_s5, 16 }
 0x4f3   :  { %p567_p7 = scmp.ne.s32.totalorder %s743_s5, %s566_s9  ;;  %p570_p8 = scmp.lt.u32.totalorder %s566_s9, %s743_s5 }
 0x4f5   :  { %p572_p9 = pnand %p570_p8, %p567_p7 }
 0x4f7   :  { %575 = shalt.err (!%p572_p9)
}
 0x4f8   :  { %446 = dma.vmem_to_hbm [thread:$0]  %s444_s30, 16, %s743_s5, [#allocation7]  }
 0x4f9   :  { %578 = dma.done.wait [#allocation4], 64  }
 0x4fa   :  { %579 = vsyncadd [#allocation4], 4294967232 }
 0x4fb   :  { %580 = dma.done.wait [#allocation7], 16  }
 0x4fc   :  { %581 = vsyncadd [#allocation7], 4294967280 }
 0x4fd   :  { %453 = vsyncpa [#allocation3], 1 }
 0x4fe   :  { %454 = vsyncpa [#allocation4], 1 }
 0x4ff   :  { %455 = vsyncpa [#allocation7], 1 }

</bundles_post_ra>
